<compile_context>
chip_gen: v7x
topology: tpu7x:2x2x1
jax: 0.10.0
libtpu: 0.0.40
codegen_flags: <defaults>
</compile_context>

<pallas_src>
import math

import jax
import jax.numpy as jnp
from jax.experimental import pallas as pl
from jax.experimental.pallas import tpu as pltpu


def _cdiv(a, b):
    return (a + b - 1) // b


def _round_up(a, b):
    return _cdiv(a, b) * b


def _make_rope_kernel(fold, half, dedup):
    def kernel(inv_ref, off_ref, cos_ref, sin_ref):
        # inv_ref/off_ref: (1, lanes_c)   cos_ref/sin_ref: (rows, lanes_o)
        rows = cos_ref.shape[0]
        lanes = inv_ref.shape[1]
        base = pl.program_id(0) * (rows * fold)                       # int32 scalar
        row = jax.lax.broadcasted_iota(jnp.int32, (rows, lanes), 0)   # sublane index
        # position of each (row, lane) element; off_ref holds the per-lane
        # position offset (l // dim) so no in-kernel integer division is needed.
        pos = base + fold * row + off_ref[...]
        emb = pos.astype(jnp.float32) * inv_ref[...]                  # == cat([freqs,freqs])
        c = jnp.cos(emb)
        s = jnp.sin(emb)
        if dedup:
            # half is a multiple of 128 here -> both half-stores are lane-dense.
            cos_ref[:, :half] = c
            cos_ref[:, half:] = c
            sin_ref[:, :half] = s
            sin_ref[:, half:] = s
        else:
            cos_ref[...] = c
            sin_ref[...] = s

    return kernel


def rotary_cache_pallas(inv_freq, seq_len, *, target_block_bytes=1 << 20):
    """Returns (cos, sin), each (seq_len, 2*len(inv_freq)) float32."""
    half = int(inv_freq.shape[0])
    dim = 2 * half
    S = int(seq_len)

    # Layout choice:
    #  * dedup path (half % 128 == 0): compute trig once on (rows, half), store twice.
    #  * folded path: fold F consecutive positions into lanes so lanes_o % 128 == 0
    #    (dim=32 -> F=4 -> 128-lane dense stores instead of 32-lane masked ones).
    dedup = (half % 128 == 0)
    if dedup:
        fold = 1
        lanes_c = half
        lanes_o = dim
        inv_c = inv_freq.astype(jnp.float32)
        off_c = jnp.zeros((lanes_c,), jnp.int32)
    else:
        fold = 128 // math.gcd(dim, 128)
        lanes_c = fold * dim
        lanes_o = fold * dim
        inv_full = jnp.concatenate([inv_freq, inv_freq]).astype(jnp.float32)
        inv_c = jnp.tile(inv_full, fold)                       # inv_c[l] = inv_full[l % dim]
        off_c = jnp.arange(lanes_c, dtype=jnp.int32) // dim    # off_c[l] = l // dim

    inv_c = inv_c.reshape(1, lanes_c)
    off_c = off_c.reshape(1, lanes_c)

    # Row-block sizing: ~1 MiB of output per block (mem-bound kernels hit ~85%+
    # of HBM roofline there), multiple of 8 sublanes.  VMEM resident is
    # 2 outputs x 2 buffers x block (~4 MiB) -> far below the 32 MiB scoped
    # default on every generation (incl. v7x), so no vmem_limit_bytes override.
    total_rows = _cdiv(S, fold)
    bytes_per_row = lanes_o * 4
    rows = max(8, (target_block_bytes // bytes_per_row) // 8 * 8)
    rows = min(rows, _round_up(total_rows, 8))
    # Prefer >= 2 grid steps when there is enough work (v7x has 2 TensorCores).
    if total_rows > 8 and _cdiv(total_rows, rows) < 2:
        rows = max(8, _round_up(_cdiv(total_rows, 2), 8))
    n_tiles = _cdiv(total_rows, rows)
    rows_pad = n_tiles * rows
    S_pad = rows_pad * fold

    # sin/cos are VPU polynomial sequences, not single EUP transcendentals.
    elems = rows_pad * lanes_c
    cost = pl.CostEstimate(
        flops=elems * (4 + 2 * 16),
        transcendentals=0,
        bytes_accessed=4 * (2 * rows_pad * lanes_o + 2 * lanes_c),
    )

    kernel = _make_rope_kernel(fold, half, dedup)
    cos_f, sin_f = pl.pallas_call(
        kernel,
        out_shape=(
            jax.ShapeDtypeStruct((rows_pad, lanes_o), jnp.float32),
            jax.ShapeDtypeStruct((rows_pad, lanes_o), jnp.float32),
        ),
        grid_spec=pltpu.PrefetchScalarGridSpec(
            num_scalar_prefetch=0,
            grid=(n_tiles,),
            in_specs=[
                pl.BlockSpec((1, lanes_c), lambda i: (0, 0)),   # inv (tiny, constant)
                pl.BlockSpec((1, lanes_c), lambda i: (0, 0)),   # per-lane pos offset
            ],
            out_specs=[
                pl.BlockSpec((rows, lanes_o), lambda i: (i, 0)),
                pl.BlockSpec((rows, lanes_o), lambda i: (i, 0)),
            ],
        ),
        compiler_params=pltpu.CompilerParams(
            dimension_semantics=("parallel",),   # independent rows -> megacore shard on v7x
        ),
        cost_estimate=cost,
    )(inv_c, off_c)

    # Row-major-preserving unfold: (rows_pad, fold*dim) -> (S_pad, dim) is the
    # same bytes, so this reshape is free.
    cos2d = cos_f.reshape(rows_pad * fold, dim)
    sin2d = sin_f.reshape(rows_pad * fold, dim)
    if S_pad != S:
        # Only hit when S is not a multiple of the (small) row alignment.
        cos2d = cos2d[:S]
        sin2d = sin2d[:S]
    return cos2d, sin2d


class RotaryEmbedding:
    """JAX/Pallas port of the PyTorch RotaryEmbedding module (forward only)."""

    def __init__(self, dim, max_position_embeddings, base=10000):
        self.dim = dim
        self.base = base
        self.inv_freq = 1.0 / (base ** (jnp.arange(0, dim, 2, dtype=jnp.float32) / dim))
        self.max_seq_len_cached = max_position_embeddings
        self._build_cache(self.max_seq_len_cached)

    def _build_cache(self, seq_len):
        cos2d, sin2d = rotary_cache_pallas(self.inv_freq, seq_len)
        self.cos_cached = cos2d[None, None, :, :]
        self.sin_cached = sin2d[None, None, :, :]

    def __call__(self, x, seq_len=None):
        # Cache growth is host-side Python control flow, exactly like the torch module.
        if seq_len > self.max_seq_len_cached:
            self.max_seq_len_cached = seq_len
            self._build_cache(seq_len)
        # Mirrors the PyTorch code verbatim: `[:seq_len, ...]` slices the size-1
        # leading dim, so the full cache is returned.
        return (self.cos_cached[:seq_len, ...], self.sin_cached[:seq_len, ...])


if __name__ == "__main__":
    # Small config consistent with the module: head dim=32, max_position_embeddings=128,
    # batch=2, seq=8 (x is only used for device/seq_len in the original forward).
    dim, max_pos, batch, seq_len = 32, 128, 2, 8

    key = jax.random.PRNGKey(0)
    x = jax.random.normal(key, (batch, 1, seq_len, dim), dtype=jnp.float32)

    rope = RotaryEmbedding(dim, max_pos)
    cos, sin = rope(x, seq_len=seq_len)
    cos, sin = jax.block_until_ready((cos, sin))

    # Pure-JAX reference (same math as the torch module).
    inv_freq = 1.0 / (10000.0 ** (jnp.arange(0, dim, 2, dtype=jnp.float32) / dim))
    t = jnp.arange(max_pos, dtype=jnp.float32)
    freqs = jnp.einsum("i,j->ij", t, inv_freq)
    emb = jnp.concatenate([freqs, freqs], axis=-1)
    ref_cos = jnp.cos(emb)[None, None, :, :]
    ref_sin = jnp.sin(emb)[None, None, :, :]

    assert cos.shape == (1, 1, max_pos, dim) and sin.shape == (1, 1, max_pos, dim)
    assert jnp.allclose(cos, ref_cos, atol=1e-5, rtol=1e-5), "cos mismatch vs reference"
    assert jnp.allclose(sin, ref_sin, atol=1e-5, rtol=1e-5), "sin mismatch vs reference"

    print("KERNEL_OK")
</pallas_src>

<mosaic_0001>
module attributes {stable_mosaic.version = 11 : i64} {
  func.func @kernel(%arg0: i32, %arg1: memref<1x128xf32, #tpu.memory_space<vmem>>, %arg2: memref<1x128xi32, #tpu.memory_space<vmem>>, %arg3: memref<16x128xf32, #tpu.memory_space<vmem>>, %arg4: memref<16x128xf32, #tpu.memory_space<vmem>>) attributes {dimension_semantics = [#tpu.dimension_semantics<parallel>], iteration_bounds = array<i64: 2>, scalar_prefetch = 0 : i64, scratch_operands = 0 : i64, tpu.core_type = #tpu.core_type<tc>, window_params = [{pipeline_mode = #tpu.pipeline_mode<synchronous>, transform_indices = @transform_0, window_bounds = array<i64: 1, 128>}, {pipeline_mode = #tpu.pipeline_mode<synchronous>, transform_indices = @transform_1, window_bounds = array<i64: 1, 128>}, {transform_indices = @transform_2, window_bounds = array<i64: 16, 128>}, {transform_indices = @transform_3, window_bounds = array<i64: 16, 128>}]} {
    %c64_i32 = arith.constant 64 : i32
    %0 = arith.muli %arg0, %c64_i32 : i32
    %1 = tpu.iota {dimensions = array<i32: 0>} : vector<16x128xi32>
    %c4_i32 = arith.constant 4 : i32
    %2 = vector.broadcast %c4_i32 : i32 to vector<16x128xi32>
    %3 = arith.muli %2, %1 : vector<16x128xi32>
    %4 = vector.broadcast %0 : i32 to vector<16x128xi32>
    %5 = arith.addi %4, %3 : vector<16x128xi32>
    %c0 = arith.constant 0 : index
    %c0_0 = arith.constant 0 : index
    %6 = vector.load %arg2[%c0, %c0_0] : memref<1x128xi32, #tpu.memory_space<vmem>>, vector<1x128xi32>
    %7 = vector.broadcast %6 : vector<1x128xi32> to vector<16x128xi32>
    %8 = arith.addi %5, %7 : vector<16x128xi32>
    %9 = arith.sitofp %8 : vector<16x128xi32> to vector<16x128xf32>
    %c0_1 = arith.constant 0 : index
    %c0_2 = arith.constant 0 : index
    %10 = vector.load %arg1[%c0_1, %c0_2] : memref<1x128xf32, #tpu.memory_space<vmem>>, vector<1x128xf32>
    %11 = vector.broadcast %10 : vector<1x128xf32> to vector<16x128xf32>
    %12 = arith.mulf %9, %11 : vector<16x128xf32>
    %13 = math.cos %12 : vector<16x128xf32>
    %14 = math.sin %12 : vector<16x128xf32>
    %c0_3 = arith.constant 0 : index
    %c0_4 = arith.constant 0 : index
    %15 = vector.load %arg3[%c0_3, %c0_4] : memref<16x128xf32, #tpu.memory_space<vmem>>, vector<16x128xf32>
    tpu.vector_store %arg3[%c0_3, %c0_4], %13 {strides = array<i32>} : memref<16x128xf32, #tpu.memory_space<vmem>>, vector<16x128xf32>,
    %c0_5 = arith.constant 0 : index
    %c0_6 = arith.constant 0 : index
    %16 = vector.load %arg4[%c0_5, %c0_6] : memref<16x128xf32, #tpu.memory_space<vmem>>, vector<16x128xf32>
    tpu.vector_store %arg4[%c0_5, %c0_6], %14 {strides = array<i32>} : memref<16x128xf32, #tpu.memory_space<vmem>>, vector<16x128xf32>,
    return
  }
  func.func @transform_0(%arg0: i32) -> (i32, i32) {
    %c0_i32 = arith.constant 0 : i32
    %c0_i32_0 = arith.constant 0 : i32
    %c0_i32_1 = arith.constant 0 : i32
    return %c0_i32, %c0_i32_0 : i32, i32
  }
  func.func @transform_1(%arg0: i32) -> (i32, i32) {
    %c0_i32 = arith.constant 0 : i32
    %c0_i32_0 = arith.constant 0 : i32
    %c0_i32_1 = arith.constant 0 : i32
    return %c0_i32, %c0_i32_0 : i32, i32
  }
  func.func @transform_2(%arg0: i32) -> (i32, i32) {
    %c0_i32 = arith.constant 0 : i32
    %c0_i32_0 = arith.constant 0 : i32
    return %arg0, %c0_i32 : i32, i32
  }
  func.func @transform_3(%arg0: i32) -> (i32, i32) {
    %c0_i32 = arith.constant 0 : i32
    %c0_i32_0 = arith.constant 0 : i32
    return %arg0, %c0_i32 : i32, i32
  }
}

</mosaic_0001>

<bundles_post_ra>
// kernel: tpu_custom_call.1
= control target key start
LH: loop header
LB: loop body
LE: loop exit
PB: predicated region body
PF: predicated region fallthrough
CT: control target
= control target key end

     0   :  { %9 = vsyncpa [#allocation3], 0  ;;  %s1278_s0 = inlined_call_operand.hbm [shape: f32[1,128], index: 0, kind: input, shape index: {}]   ;;  %s1279_s1 = inlined_call_operand.vmem [shape: s32[1,128], index: 1, kind: input, shape index: {}]   ;;  %s1280_s2 = inlined_call_operand.hbm [shape: f32[32,128], index: 2, kind: output, shape index: {0}]   ;;  %s1281_s3 = inlined_call_operand.hbm [shape: f32[32,128], index: 3, kind: output, shape index: {1}]  }
   0x1   :  { %10 = vsyncpa [#allocation4], 0 }
   0x2   :  { %12 = vsyncpa [#allocation4 + $0x1], 0 }
   0x3   :  { %13 = vsyncpa [#allocation7], 0 }
   0x4   :  { %15 = vsyncpa [#allocation7 + $0x1], 0  ;;  %s1023_s12 = smov 0   ;;  %s1025_s13 = smov 0  }
   0x5   :  { %s1027_s14 = smov 0   ;;  %s1029_s15 = smov 0  }
   0x6 LB: > { %s1044_s16 = sadd.s32 4294967295, %s990_s15   ;;  %s749_s17 = sadd.s32 4294967294, %s990_s15   ;;  %s990_s15 = sphi %s1029_s15, %s1297_s15   ;;  %s986_s14 = sphi %s1027_s14, %s1296_s14   ;;  %s982_s13 = sphi %s1025_s13, %s1295_s13   ;;  %s978_s12 = sphi %s1023_s12, %s1294_s12  }
   0x7   : > { %s1048_s18 = sadd.s32 1, %s990_s15   ;;  %s70_s19 = sadd.s32 1, %s986_s14 }
   0x8   : > { %s67_s20 = ssub.s32 %s990_s15, %s1048_s18  ;;  %p80_p0 = scmp.ne.s32.totalorder %s986_s14, %s982_s13 }
   0x9   : > { %p68_p1 = scmp.eq.s32.totalorder %s67_s20, 0  ;;  %p81_p2 = scmp.eq.s32.totalorder %s1044_s16, 1 }
   0xa   : > { %p86_p3 = scmp.ne.s32.totalorder %s982_s13, %s978_s12  ;;  %p87_p4 = scmp.eq.s32.totalorder %s749_s17, 1 }
   0xb   : > { %s1059_s21 = scalar_select %p68_p1, %s986_s14, %s70_s19  }
   0xc   : > { %p1061_p5 = por %p81_p2, %p80_p0  ;;  %p1065_p6 = por %p87_p4, %p86_p3 }
   0xd   : > { %p750_p7 = scmp.ge.s32.totalorder %s990_s15, 1  ;;  %p120_p8 = scmp.lt.s32.totalorder %s990_s15, 3 }
   0xe   : > { %s1285_s22 = scalar_select %p1061_p5, 1, 0 }
   0xf   : > { %s1286_s23 = scalar_select %p1065_p6, 1, 0 }
  0x10   : > { %p1282_p9 = scmp.eq.s32.totalorder %s1044_s16, 0  ;;  %p1072_p10 = pnand %p750_p7, %p120_p8 }
  0x11   : > { %s992_s25 = smov [#allocation2]   ;;  %s864_s30 = scalar_lea.hbm %s1278_s0, 16 }
  0x12   : > { %s1287_s24 = scalar_select %p1072_p10, 1, 0 }
  0x13   : > { %s133_s26 = sshll.u32 %s992_s25, 4  ;;  %p801_p11 = pneg %p1072_p10  ;;  %s134_s26 = int_to_ptr.vmem [resolvable:$true] %s133_s26 }
  0x14   : > { %p865_p13 = scmp.ne.s32.totalorder %s1278_s0, %s864_s30  ;;  %p871_p3 = scmp.lt.u32.totalorder %s864_s30, %s1278_s0 }
  0x15   : > { %p1080_p12 = pnand %p1282_p9, %p801_p11 }
  0x17   : > { %p866_p0 = pneg %p1080_p12 }
  0x19   : > { %p867_p1 = pnand %p866_p0, %p865_p13 }
  0x1b   : > { %p868_p2 = pneg %p867_p1 }
  0x1d   : > { %p873_p4 = pnand %p871_p3, %p868_p2 }
  0x1f   : > { %876 = shalt.err (!%p873_p4)
}
  0x20   : > { %s877_s8 = scalar_lea.vmem %s134_s26, 16  ;;  %s884_s9 = scalar_lea.vmem %s134_s26, 32 }
  0x21   : > { %p878_p7 = scmp.ne.s32.totalorder %s134_s26, %s877_s8  ;;  %p885_p9 = scmp.lt.s32.totalorder %s134_s26, %s134_s26 }
  0x22   : > { %p886_p6 = scmp.lt.s32.totalorder %s884_s9, %s877_s8 }
  0x23   : > { %p880_p8 = pnand %p878_p7, %p866_p0 }
  0x24   : > { %p887_p5 = por %p886_p6, %p885_p9 }
  0x25   : > { %p881_p11 = pneg %p880_p8 }
  0x27   : > { %p888_p10 = pnand %p887_p5, %p881_p11 }
  0x29   : > { %891 = shalt.err (!%p888_p10)
}
  0x2a   : > { %804 = dma.hbm_to_vmem [thread:$0]  (!%p1080_p12), %s1278_s0, 16, %s134_s26, [#allocation3]  }
  0x2b   : > { %p1289_p13 = scmp.ne.s32.totalorder %s1287_s24, 0 }
  0x2c   : > { %p1290_p1 = scmp.eq.s32.totalorder (!%p1289_p13), %s1044_s16, 0 }
  0x2d   : > { %149 = sbr.rel (%p1289_p13) target bundleno = 195 (0xc3), region = 28 }
  0x34   : > { %965 = dma.done.wait (%p1290_p1), [#allocation3], 16   ;;  %p1291_p0 = pmov %p1290_p1 }
  0x35   : > { %s756_s17 = sshll.u32 %s1044_s16, 6  ;;  %v176_v0 = vlaneseq  ;;  %v757_v7 = vld [vmem:[%s1279_s1] ss:$0 sm:$0xff]  ;;  %v993_v35 = vmov 683565275   ;;  %s1176_s24 = sand.u32 1, %s982_s13  }
  0x36   : > { %967 = vsyncadd (%p1291_p0), [#allocation3], 4294967280  ;;  %v181_v2 = vstv %s756_s17  ;;  %v758_v10 = vld [vmem:[#allocation2] ss:$0 sm:$0xff]  ;;  %v994_v37 = vmov 2475754826  }
  0x37   : > { %v177_v1 = vshrl.u32 %v176_v0, 7  ;;  %v995_v39 = vmov 2131351028   ;;  %v996_v41 = vmov 2102212464   ;;  %s754_s25 = sshll.u32 %s1176_s24, 4 }
  0x38   : > { %v997_v43 = vmov 920167782   ;;  %v998_v50 = vmov 1326507024   ;;  %s1181_s26 = scalar_lea.vmem [#allocation5], %s754_s25  ;;  %s1184_s27 = scalar_lea.vmem [#allocation6], %s754_s25 }
  0x39   : > { %v179_v3 = vmul.u32 4, %v177_v1  ;;  %v178_v4 = vadd.s32 8, %v177_v1  ;;  %s639_s28 = sshll.u32 %s1181_s26, 4  ;;  %s783_s29 = sshll.u32 %s1044_s16, 8  ;;  %s1191_s28 = int_to_ptr.vmem [resolvable:$true] %s639_s28 }
  0x3a   : > { %s655_s30 = sshll.u32 %s1184_s27, 4  ;;  %s1196_s5 = scalar_lea.hbm %s1280_s2, %s783_s29  ;;  %s1198_s30 = int_to_ptr.vmem [resolvable:$true] %s655_s30 }
  0x3b   : > { %v182_v5 = vadd.s32 %v181_v2, %v179_v3  ;;  %v180_v6 = vmul.u32 4, %v178_v4  ;;  %s1203_s8 = scalar_lea.hbm %s1281_s3, %s783_s29  ;;  %s621_s9 = scalar_lea.sflag [#allocation4], %s1176_s24 }
  0x3c   : > { %s892_s10 = scalar_lea.vmem %s1191_s28, 256  ;;  %p1292_p6 = scmp.ne.s32.totalorder %s1285_s22, 0 }
  0x3d   : > { %v189_v8 = vadd.s32 %v757_v7, %v182_v5  ;;  %v183_v9 = vadd.s32 %v181_v2, %v180_v6  ;;  %p893_p5 = scmp.ne.s32.totalorder %s1191_s28, %s892_s10  ;;  %s999_s11 = smov [#allocation5]  }
  0x3e   : > { %s896_s17 = sshll.u32 %s999_s11, 4  ;;  %s897_s17 = int_to_ptr.vmem [resolvable:$false] %s896_s17 }
  0x3f   : > { %v191_v11 = vcvt.s32.f32 %v189_v8  ;;  %v190_v12 = vadd.s32 %v757_v7, %v183_v9  ;;  %p894_p9 = pnand %p893_p5, %p1292_p6  ;;  %s898_s19 = scalar_lea.vmem %s897_s17, 512 }
  0x40   : > { %p899_p12 = scmp.lt.s32.totalorder %s1191_s28, %s897_s17  ;;  %p900_p2 = scmp.lt.s32.totalorder %s898_s19, %s892_s10 }
  0x41   : > { %v1110_v13 = vmul.f32 %v758_v10, %v191_v11  ;;  %v192_v14 = vcvt.s32.f32 %v190_v12  ;;  %p895_p10 = pneg %p894_p9 }
  0x42   : > { %p901_p3 = por %p900_p2, %p899_p12 }
  0x43   : > { %v202_v15 = vand.u32 2147483647, %v1110_v13  ;;  %v205_v16 = vand.u32 2139095040, %v1110_v13  ;;  %v1114_v17 = vmul.f32 %v758_v10, %v192_v14  ;;  %vm204_vm14 = vcmp.lt.s32.totalorder %v1110_v13, 0 }
  0x44   : > { %p902_p4 = pnand %p901_p3, %p895_p10 }
  0x45   : > { %v206_v18 = vshrl.u32 %v205_v16, 23  ;;  %v209_v19 = vand.u32 8388607, %v202_v15  ;;  %v305_v20 = vand.u32 2147483647, %v1114_v17  ;;  %v308_v21 = vand.u32 2139095040, %v1114_v17 }
  0x46   : > { %vm203_vm15 = vcmp.le.f32.partialorder %v202_v15, 0.7853982 }
  0x47   : > { %v759_v22 = vadd.s32 4294967169, %v206_v18  ;;  %v309_v23 = vshrl.u32 %v308_v21, 23  ;;  %v210_v25 = vor.u32 8388608, %v209_v19  ;;  %v1122_v27 = vand.u32 8388607, %v305_v20 }
  0x49   : > { %v212_v24 = vadd.s32 1, %v759_v22  ;;  %v763_v26 = vadd.s32 4294967169, %v309_v23  ;;  %v1124_v32 = vshll.u32 %v210_v25, 8  ;;  %v313_v33 = vor.u32 8388608, %v1122_v27 }
  0x4b   : > { %vm213_vm0 = vcmp.gt.s32.totalorder %v212_v24, 0  ;;  %v315_v29 = vadd.s32 1, %v763_v26 }
  0x4c   : > { %v214_v28 = vsel %vm213_vm0, %v212_v24, 0  ;;  %vm307_vm0 = vcmp.lt.s32.totalorder %v1114_v17, 0 }
  0x4d   : > { %v215_v30 = vshrl.u32 %v214_v28, 5  ;;  %v216_v31 = vand.u32 31, %v214_v28  ;;  %vm316_vm1 = vcmp.gt.s32.totalorder %v315_v29, 0 }
  0x4e   : > { %v317_v55 = vsel %vm316_vm1, %v315_v29, 0  ;;  %vm306_vm1 = vcmp.le.f32.partialorder %v305_v20, 0.7853982 }
  0x4f   : > { %v217_v34 = vsub.s32 32, %v216_v31  ;;  %v219_v36 = vshll.u32 %v993_v35, %v216_v31  ;;  %v222_v38 = vshll.u32 %v994_v37, %v216_v31  ;;  %v225_v40 = vshll.u32 %v995_v39, %v216_v31 }
  0x50   : > { %v228_v42 = vshll.u32 %v996_v41, %v216_v31  ;;  %v231_v44 = vshll.u32 %v997_v43, %v216_v31  ;;  %vm234_vm2 = vcmp.lt.s32.totalorder %v215_v30, 1  ;;  %vm235_vm3 = vcmp.lt.s32.totalorder %v215_v30, 2 }
  0x51   : > { %v218_v45 = vshrl.u32 %v993_v35, %v217_v34  ;;  %v220_v46 = vshrl.u32 %v994_v37, %v217_v34  ;;  %v223_v47 = vshrl.u32 %v995_v39, %v217_v34  ;;  %v226_v48 = vshrl.u32 %v996_v41, %v217_v34 }
  0x52   : > { %v229_v49 = vshrl.u32 %v997_v43, %v217_v34  ;;  %v232_v51 = vshrl.u32 %v998_v50, %v217_v34  ;;  %vm236_vm4 = vcmp.lt.s32.totalorder %v215_v30, 3  ;;  %vm237_vm5 = vcmp.lt.s32.totalorder %v215_v30, 4 }
  0x53   : > { %v221_v52 = vor.u32 %v220_v46, %v219_v36  ;;  %v224_v53 = vor.u32 %v223_v47, %v222_v38  ;;  %v227_v54 = vor.u32 %v226_v48, %v225_v40  ;;  %v318_v58 = vshrl.u32 %v317_v55, 5 }
  0x54   : > { %v230_v56 = vor.u32 %v229_v49, %v228_v42  ;;  %v233_v57 = vor.u32 %v232_v51, %v231_v44  ;;  %v319_v59 = vand.u32 31, %v317_v55 }
  0x55   : > { %v238_v60 = vsel %vm234_vm2, %v218_v45, %v221_v52  ;;  %v239_v61 = vsel %vm237_vm5, %v227_v54, 2102212464  ;;  %v242_v62 = vsel %vm234_vm2, %v221_v52, %v224_v53  ;;  %v246_v63 = vsel %vm234_vm2, %v224_v53, %v227_v54 }
  0x56   : > { %v240_v0 = vsel %vm236_vm4, %v224_v53, %v239_v61  ;;  %v243_v1 = vsel %vm237_vm5, %v230_v56, 920167782  ;;  %v247_v2 = vsel %vm237_vm5, %v233_v57, 1326507024  ;;  %v320_v3 = vsub.s32 32, %v319_v59 }
  0x57   : > { %v241_v4 = vsel %vm235_vm3, %v238_v60, %v240_v0  ;;  %v244_v5 = vsel %vm236_vm4, %v227_v54, %v243_v1  ;;  %v248_v6 = vsel %vm236_vm4, %v230_v56, %v247_v2  ;;  %v322_v7 = vshll.u32 %v993_v35, %v319_v59 }
  0x58   : > { %v245_v8 = vsel %vm235_vm3, %v242_v62, %v244_v5  ;;  %v249_v9 = vsel %vm235_vm3, %v246_v63, %v248_v6  ;;  %v257_v10 = vmul.u32 %v1124_v32, %v241_v4  ;;  %v321_v11 = vshrl.u32 %v993_v35, %v320_v3 }
  0x59   : > { %v1139_v12 = vmul.u32.u64.low %v1124_v32, %v249_v9  ;;  %v1140_v14 = vmul.u32.u64.high %v1124_v32, %v249_v9, %v1139_v12  ;;  %v1143_v16 = vmul.u32.u64.low %v1124_v32, %v245_v8  ;;  %v1144_v18 = vmul.u32.u64.high %v1124_v32, %v245_v8, %v1143_v16 }
  0x5a   : > { %v323_v19 = vshrl.u32 %v994_v37, %v320_v3  ;;  %v325_v21 = vshll.u32 %v994_v37, %v319_v59  ;;  %v326_v22 = vshrl.u32 %v995_v39, %v320_v3  ;;  %v328_v23 = vshll.u32 %v995_v39, %v319_v59 }
  0x5b   : > { %v329_v24 = vshrl.u32 %v996_v41, %v320_v3  ;;  %v331_v25 = vshll.u32 %v996_v41, %v319_v59  ;;  %v332_v26 = vshrl.u32 %v997_v43, %v320_v3  ;;  %v334_v28 = vshll.u32 %v997_v43, %v319_v59 }
  0x5c   : > { %v324_v29 = vor.u32 %v323_v19, %v322_v7  ;;  %v327_v30 = vor.u32 %v326_v22, %v325_v21  ;;  %v335_v31 = vshrl.u32 %v998_v50, %v320_v3  ;;  %vm337_vm6 = vcmp.lt.s32.totalorder %v318_v58, 1 }
  0x5d   : > { %vm259_vm7 = vc.u32 %v1140_v14, %v1143_v16  ;;  %v260_v34 = vadd.s32 1, %v1144_v18  ;;  %v330_v35 = vor.u32 %v329_v24, %v328_v23  ;;  %v353_v32 = vshll.u32 %v313_v33, 8 }
  0x5e   : > { %v333_v36 = vor.u32 %v332_v26, %v331_v25  ;;  %v336_v37 = vor.u32 %v335_v31, %v334_v28  ;;  %vm338_vm8 = vcmp.lt.s32.totalorder %v318_v58, 2  ;;  %vm339_vm9 = vcmp.lt.s32.totalorder %v318_v58, 3 }
  0x5f   : > { %v261_v38 = vsel %vm259_vm7, %v260_v34, %v1144_v18  ;;  %vm340_vm10 = vcmp.lt.s32.totalorder %v318_v58, 4  ;;  %v341_v39 = vsel %vm337_vm6, %v321_v11, %v324_v29  ;;  %v345_v40 = vsel %vm337_vm6, %v324_v29, %v327_v30 }
  0x60   : > { %v262_v41 = vadd.s32 %v261_v38, %v257_v10  ;;  %v342_v42 = vsel %vm340_vm10, %v330_v35, 2102212464  ;;  %v346_v43 = vsel %vm340_vm10, %v333_v36, 920167782  ;;  %v349_v44 = vsel %vm337_vm6, %v327_v30, %v330_v35 }
  0x61   : > { %v343_v45 = vsel %vm339_vm9, %v327_v30, %v342_v42  ;;  %v347_v46 = vsel %vm339_vm9, %v330_v35, %v346_v43  ;;  %v350_v27 = vsel %vm340_vm10, %v336_v37, 1326507024  ;;  %v258_v5 = vadd.s32 %v1143_v16, %v1140_v14 }
  0x62   : > { %v263_v33 = vadd.s32 536870912, %v262_v41  ;;  %v348_v47 = vsel %vm338_vm8, %v345_v40, %v347_v46  ;;  %v351_v48 = vsel %vm339_vm9, %v333_v36, %v350_v27  ;;  %v344_v49 = vsel %vm338_vm8, %v341_v39, %v343_v45 }
  0x63   : > { %v352_v50 = vsel %vm338_vm8, %v349_v44, %v351_v48  ;;  %v1157_v51 = vmul.u32.u64.low %v353_v32, %v348_v47  ;;  %v1158_v52 = vmul.u32.u64.high %v353_v32, %v348_v47, %v1157_v51  ;;  %v360_v57 = vmul.u32 %v353_v32, %v344_v49 }
  0x64   : > { %v264_v53 = vshrl.u32 %v263_v33, 30  ;;  %v1160_v54 = vmul.u32.u64.low %v353_v32, %v352_v50  ;;  %v1161_v55 = vmul.u32.u64.high %v353_v32, %v352_v50, %v1160_v54  ;;  %vm294_vm8 = vweird.f32 %v1110_v13 }
  0x65   : > { %v363_v59 = vadd.s32 1, %v1158_v52 }
  0x66   : > { %v265_v56 = vshll.u32 %v264_v53, 30  ;;  %vm362_vm11 = vc.u32 %v1161_v55, %v1157_v51  ;;  %v288_v29 = vsub.s32 4, %v264_v53  ;;  %v361_v14 = vadd.s32 %v1157_v51, %v1161_v55 }
  0x67   : > { %v364_v61 = vsel %vm362_vm11, %v363_v59, %v1158_v52 }
  0x68   : > { %v266_v60 = vsub.s32 %v262_v41, %v265_v56  ;;  %v365_v63 = vadd.s32 %v364_v61, %v360_v57  ;;  %v289_v36 = vsel %vm204_vm14, %v288_v29, %v264_v53 }
  0x69   : > { %v291_v41 = vsel %vm203_vm15, 0, %v289_v36 }
  0x6a   : > { %v268_v62 = vsub.s32 0, %v266_v60  ;;  %v366_v0 = vadd.s32 536870912, %v365_v63  ;;  %v501_v46 = vadd.s32 3, %v291_v41  ;;  %v295_v15 = vand.u32 3, %v291_v41 }
  0x6c   : > { %v760_v58 = vmin.u32 %v268_v62, %v266_v60  ;;  %v367_v2 = vshrl.u32 %v366_v0, 30  ;;  %v502_v48 = vand.u32 3, %v501_v46  ;;  %vm300_vm2 = vcmp.eq.s32.totalorder %v295_v15, 2 }
  0x6d   : > { %vm297_vm4 = vcmp.eq.s32.totalorder %v295_v15, 0  ;;  %vm296_vm6 = vcmp.lt.s32.totalorder %v295_v15, 2 }
  0x6e   : > { %v270_v1 = vclz %v760_v58  ;;  %v368_v4 = vshll.u32 %v367_v2, 30  ;;  %v391_v33 = vsub.s32 4, %v367_v2  ;;  %vm507_vm3 = vcmp.eq.s32.totalorder %v502_v48, 2 }
  0x6f   : > { %vm504_vm5 = vcmp.eq.s32.totalorder %v502_v48, 0  ;;  %vm503_vm7 = vcmp.lt.s32.totalorder %v502_v48, 2 }
  0x70   : > { %v761_v3 = vadd.s32 4294967294, %v270_v1  ;;  %v369_v7 = vsub.s32 %v365_v63, %v368_v4  ;;  %v392_v50 = vsel %vm307_vm0, %v391_v33, %v367_v2 }
  0x71   : > { %v394_v54 = vsel %vm306_vm1, 0, %v392_v50 }
  0x72   : > { %vm762_vm12 = vcmp.lt.s32.totalorder %v761_v3, 0  ;;  %v371_v11 = vsub.s32 0, %v369_v7  ;;  %v398_v2 = vand.u32 3, %v394_v54 }
  0x73   : > { %v273_v6 = vsel %vm762_vm12, 0, %v761_v3 }
  0x74   : > { %v274_v8 = vsub.s32 32, %v273_v6  ;;  %v275_v9 = vshll.u32 %v266_v60, %v273_v6  ;;  %v278_v10 = vsub.s32 4294967266, %v273_v6  ;;  %v764_v19 = vmin.u32 %v371_v11, %v369_v7 }
  0x75   : > { %v605_v60 = vadd.s32 3, %v394_v54  ;;  %vm403_vm9 = vcmp.eq.s32.totalorder %v398_v2, 2  ;;  %vm400_vm11 = vcmp.eq.s32.totalorder %v398_v2, 0 }
  0x76   : > { %v276_v12 = vshrl.u32 %v258_v5, %v274_v8  ;;  %v279_v18 = vadd.s32 127, %v278_v10  ;;  %v373_v23 = vclz %v764_v19 }
  0x78   : > { %v277_v21 = vor.u32 %v276_v12, %v275_v9  ;;  %v280_v22 = vshll.u32 %v279_v18, 23  ;;  %v765_v26 = vadd.s32 4294967294, %v373_v23 }
  0x7a   : > { %v281_v24 = vor.u32 4788187, %v280_v22  ;;  %v284_v25 = vcvt.s32.f32 %v277_v21  ;;  %vm766_vm13 = vcmp.lt.s32.totalorder %v765_v26, 0 }
  0x7b   : > { %v376_v30 = vsel %vm766_vm13, 0, %v765_v26  ;;  %vm399_vm13 = vcmp.lt.s32.totalorder %v398_v2, 2 }
  0x7c   : > { %v282_v28 = vand.u32 2147483647, %v281_v24  ;;  %v377_v31 = vsub.s32 32, %v376_v30  ;;  %v378_v34 = vshll.u32 %v369_v7, %v376_v30  ;;  %v381_v35 = vsub.s32 4294967266, %v376_v30 }
  0x7e   : > { %v285_v16 = vmul.f32 %v284_v25, %v282_v28  ;;  %v379_v37 = vshrl.u32 %v361_v14, %v377_v31  ;;  %v382_v38 = vadd.s32 127, %v381_v35 }
  0x80   : > { %v286_v32 = vxor.u32 2147483648, %v285_v16  ;;  %v380_v42 = vor.u32 %v379_v37, %v378_v34  ;;  %v383_v43 = vshll.u32 %v382_v38, 23 }
  0x82   : > { %v287_v39 = vsel %vm204_vm14, %v286_v32, %v285_v16  ;;  %v384_v44 = vor.u32 4788187, %v383_v43  ;;  %v387_v45 = vcvt.s32.f32 %v380_v42 }
  0x83   : > { %v290_v40 = vsel %vm203_vm15, %v1110_v13, %v287_v39  ;;  %v606_v13 = vand.u32 3, %v605_v60  ;;  %vm397_vm15 = vweird.f32 %v1114_v17 }
  0x84   : > { %856 = vcosq.f32 %v290_v40  ;;  %v385_v27 = vand.u32 2147483647, %v384_v44 }
  0x85   : > { %858 = vsinq.f32 %v290_v40  ;;  %vm611_vm10 = vcmp.eq.s32.totalorder %v606_v13, 2  ;;  %vm608_vm12 = vcmp.eq.s32.totalorder %v606_v13, 0  ;;  %vm607_vm14 = vcmp.lt.s32.totalorder %v606_v13, 2 }
  0x86   : > { %v388_v47 = vmul.f32 %v387_v45, %v385_v27 }
  0x88   : > { %v389_v49 = vxor.u32 2147483648, %v388_v47 }
  0x8a   : > { %v390_v51 = vsel %vm307_vm0, %v389_v49, %v388_v47 }
  0x8b   : > { %v393_v53 = vsel %vm306_vm1, %v1114_v17, %v390_v51 }
  0x8c   : > { %860 = vcosq.f32 %v393_v53 }
  0x8d   : > { %862 = vsinq.f32 %v393_v53 }
  0x8e   : > { %v857_v52 = vpop.eup %856 }
  0x8f   : > { %v859_v55 = vpop.eup %858  ;;  %v301_v56 = vxor.u32 2147483648, %v857_v52 }
  0x90   : > { %v298_v20 = vxor.u32 2147483648, %v859_v55 }
  0x91   : > { %v302_v57 = vsel %vm300_vm2, %v301_v56, %v859_v55  ;;  %v509_v59 = vsel %vm507_vm3, %v301_v56, %v859_v55 }
  0x92   : > { %v299_v61 = vsel %vm297_vm4, %v857_v52, %v298_v20  ;;  %v506_v62 = vsel %vm504_vm5, %v857_v52, %v298_v20 }
  0x93   : > { %v303_v63 = vsel %vm296_vm6, %v299_v61, %v302_v57  ;;  %v510_v58 = vsel %vm503_vm7, %v506_v62, %v509_v59 }
  0x94   : > { %v304_v0 = vsel %vm294_vm8, nan, %v303_v63  ;;  %v511_v1 = vsel %vm294_vm8, nan, %v510_v58 }
  0x95   : > { %616 = vst [vmem:[%s1181_s26] sm:$0xff] %v304_v0  ;;  %618 = vst [vmem:[%s1184_s27] sm:$0xff] %v511_v1 }
  0x96   : > { %v861_v3 = vpop.eup %860 }
  0x97   : > { %v863_v4 = vpop.eup %862  ;;  %v404_v5 = vxor.u32 2147483648, %v861_v3 }
  0x98   : > { %v401_v6 = vxor.u32 2147483648, %v863_v4 }
  0x99   : > { %v405_v7 = vsel %vm403_vm9, %v404_v5, %v863_v4  ;;  %v613_v8 = vsel %vm611_vm10, %v404_v5, %v863_v4 }
  0x9a   : > { %v402_v9 = vsel %vm400_vm11, %v861_v3, %v401_v6  ;;  %v610_v10 = vsel %vm608_vm12, %v861_v3, %v401_v6 }
  0x9b   : > { %v406_v11 = vsel %vm399_vm13, %v402_v9, %v405_v7  ;;  %v614_v12 = vsel %vm607_vm14, %v610_v10, %v613_v8 }
  0x9c   : > { %v407_v17 = vsel %vm397_vm15, nan, %v406_v11  ;;  %v615_v18 = vsel %vm397_vm15, nan, %v614_v12 }
  0x9d   : > { %617 = vst [vmem:[%s1181_s26 + $0x8] sm:$0xff] %v407_v17  ;;  %619 = vst [vmem:[%s1184_s27 + $0x8] sm:$0xff] %v615_v18 }
  0x9e   : > { %905 = shalt.err (!%p902_p4)
}
  0x9f   : > { %s906_s20 = scalar_lea.hbm %s1196_s5, 256  ;;  %s910_s27 = scalar_lea.hbm %s1280_s2, 512 }
  0xa0   : > { %p907_p7 = scmp.ne.s32.totalorder %s1196_s5, %s906_s20  ;;  %p911_p13 = scmp.lt.u32.totalorder %s1196_s5, %s1280_s2 }
  0xa1   : > { %p912_p1 = scmp.lt.u32.totalorder %s910_s27, %s906_s20  ;;  %p914_p5 = scmp.lt.u32.totalorder %s906_s20, %s1196_s5 }
  0xa2   : > { %p908_p8 = pnand %p907_p7, %p1292_p6 }
  0xa3   : > { %p913_p0 = por %p912_p1, %p911_p13 }
  0xa4   : > { %p909_p11 = pneg %p908_p8 }
  0xa5   : > { %p915_p9 = por %p914_p5, %p913_p0 }
  0xa7   : > { %p916_p10 = pnand %p915_p9, %p909_p11 }
  0xa9   : > { %919 = shalt.err (!%p916_p10)
}
  0xaa   : > { %s1000_s16 = smov 128   ;;  %s1001_s6 = smov 8  }
  0xab   : > { %797 = dma.vmem_to_hbm [thread:$0]  (%p1292_p6), %s1191_s28, 256, %s1196_s5, %s621_s9, %s1000_s16, %s1000_s16, %s1001_s6  }
  0xac   : > { %s626_s7 = scalar_lea.sflag [#allocation7], %s1176_s24  ;;  %s920_s10 = scalar_lea.vmem %s1198_s30, 256 }
  0xad   : > { %p921_p12 = scmp.ne.s32.totalorder %s1198_s30, %s920_s10  ;;  %s1002_s11 = smov [#allocation6]  }
  0xae   : > { %s924_s17 = sshll.u32 %s1002_s11, 4  ;;  %s925_s17 = int_to_ptr.vmem [resolvable:$false] %s924_s17 }
  0xaf   : > { %p922_p2 = pnand %p921_p12, %p1292_p6  ;;  %s926_s19 = scalar_lea.vmem %s925_s17, 512 }
  0xb0   : > { %p927_p4 = scmp.lt.s32.totalorder %s1198_s30, %s925_s17  ;;  %p928_p7 = scmp.lt.s32.totalorder %s926_s19, %s920_s10 }
  0xb1   : > { %p923_p3 = pneg %p922_p2 }
  0xb2   : > { %p929_p8 = por %p928_p7, %p927_p4 }
  0xb4   : > { %p930_p11 = pnand %p929_p8, %p923_p3 }
  0xb6   : > { %933 = shalt.err (!%p930_p11)
}
  0xb7   : > { %s934_s28 = scalar_lea.hbm %s1203_s8, 256  ;;  %s938_s20 = scalar_lea.hbm %s1281_s3, 512 }
  0xb8   : > { %p935_p13 = scmp.ne.s32.totalorder %s1203_s8, %s934_s28  ;;  %p939_p5 = scmp.lt.u32.totalorder %s1203_s8, %s1281_s3 }
  0xb9   : > { %p940_p9 = scmp.lt.u32.totalorder %s938_s20, %s934_s28  ;;  %p942_p12 = scmp.lt.u32.totalorder %s934_s28, %s1203_s8 }
  0xba   : > { %p936_p1 = pnand %p935_p13, %p1292_p6 }
  0xbb   : > { %p941_p10 = por %p940_p9, %p939_p5 }
  0xbc   : > { %p937_p0 = pneg %p936_p1 }
  0xbd   : > { %p943_p2 = por %p942_p12, %p941_p10 }
  0xbf   : > { %p944_p3 = pnand %p943_p2, %p937_p0 }
  0xc1   : > { %947 = shalt.err (!%p944_p3)
}
  0xc2   : > { %798 = dma.vmem_to_hbm [thread:$0]  (%p1292_p6), %s1198_s30, 256, %s1203_s8, %s626_s7, %s1000_s16, %s1000_s16, %s1001_s6  }
  0xc3 PF: > { %p814_p4 = scmp.ge.s32.totalorder %s990_s15, 2  ;;  %s670_s27 = sand.u32 1, %s978_s12  }
  0xc4   : > { %p1293_p7 = scmp.ne.s32.totalorder %s1286_s23, 0  ;;  %s671_s29 = scalar_lea.sflag [#allocation4], %s670_s27 }
  0xc6   : > { %p806_p8 = pnand %p814_p4, %p1293_p7 }
  0xc8   : > { %969 = dma.done.wait (!%p806_p8), %s671_s29, 256  }
  0xc9   : > { %971 = vsyncadd (!%p806_p8), %s671_s29, 4294967040  ;;  %s680_s22 = scalar_lea.sflag [#allocation7], %s670_s27 }
  0xca   : > { %973 = dma.done.wait (!%p806_p8), %s680_s22, 256  }
  0xcb   : > { %975 = vsyncadd (!%p806_p8), %s680_s22, 4294967040  ;;  %p18_p6 = scmp.ge.s32.totalorder %s1048_s18, 4   ;;  %s1294_s12 = smov %s982_s13 }
  0xcc   : > { %s1295_s13 = smov %s986_s14  ;;  %s1296_s14 = smov %s1059_s21 }
  0xcd   : > { %s1297_s15 = smov %s1048_s18  ;;  %20 = sbr.rel (!%p18_p6) target bundleno = 6 (0x6), region = 82 }
  0xd4   :  { %685 = vsyncpa [#allocation3], 1 }
  0xd5   :  { %687 = vsyncpa [#allocation3 + $0x1], 1 }
  0xd6   :  { %688 = vsyncpa [#allocation4], 1 }
  0xd7   :  { %690 = vsyncpa [#allocation4 + $0x1], 1 }
  0xd8   :  { %691 = vsyncpa [#allocation7], 1 }
  0xd9   :  { %693 = vsyncpa [#allocation7 + $0x1], 1 }

</bundles_post_ra>
